<compile_context>
chip_gen: v6e
topology: v6e:2x2x1
jax: 0.10.0
libtpu: 0.0.40
codegen_flags: <defaults>
</compile_context>

<pallas_src>
import functools

import jax
import jax.numpy as jnp
from jax import lax
from jax.experimental import pallas as pl
from jax.experimental.pallas import tpu as pltpu

_INV_SQRT2 = 0.7071067811865476
_LN_EPS = 1e-5


def _adapter_kernel(x_ref, wd_ref, bd_ref, wu_ref, bu_ref,
                    gamma_ref, beta_ref, o_ref):
    # x tile: (TM, H) in the caller's dtype (f32 or bf16). Weights are
    # VMEM-resident across the whole grid (constant index_map).
    x = x_ref[...]
    x_f32 = x.astype(jnp.float32)          # residual / LN path in f32
    x_bf = x.astype(jnp.bfloat16)          # MXU operand

    wd = wd_ref[...]                       # (H, A) bf16
    wu = wu_ref[...]                       # (A, H) bf16
    bd = bd_ref[...].astype(jnp.float32)   # (1, A)
    bu = bu_ref[...].astype(jnp.float32)   # (1, H)
    gamma = gamma_ref[...].astype(jnp.float32)   # (1, H)
    beta = beta_ref[...].astype(jnp.float32)     # (1, H)

    # down_project (bf16 x bf16 -> f32 acc) + exact GELU: 0.5*h*(1+erf(h/sqrt(2)))
    h = jnp.dot(x_bf, wd, preferred_element_type=jnp.float32) + bd
    h = 0.5 * h * (1.0 + lax.erf(h * _INV_SQRT2))
    # up_project (bf16 x bf16 -> f32 acc)
    h = jnp.dot(h.astype(jnp.bfloat16), wu,
                preferred_element_type=jnp.float32) + bu
    # residual (f32)
    h = h + x_f32

    # LayerNorm over H — two-pass (mean, then centered variance) for robustness.
    mean = jnp.mean(h, axis=-1, keepdims=True)
    c = h - mean
    var = jnp.mean(c * c, axis=-1, keepdims=True)
    inv = lax.rsqrt(var + _LN_EPS)
    y = c * inv * gamma + beta

    o_ref[...] = y.astype(o_ref.dtype)


def _round_up(x, m):
    return (x + m - 1) // m * m


@functools.partial(jax.jit, static_argnames=("block_tokens",))
def text_adapter_forward(hidden_states, params, *, block_tokens=2048):
    """hidden_states: (B, S, H) f32 or bf16. params: dict of adapter weights."""
    B, S, H = hidden_states.shape
    A = params["wd"].shape[1]
    N = B * S
    x2d = hidden_states.reshape(N, H)
    itemsize = jnp.dtype(hidden_states.dtype).itemsize

    # Weights as bf16 MXU operands (tiny arrays; cast once per call).
    wd = params["wd"].astype(jnp.bfloat16)
    wu = params["wu"].astype(jnp.bfloat16)

    # --- VMEM budget ---------------------------------------------------------
    # Resident params (double-buffered by default) + 4 in-flight (double-
    # buffered x/out) tiles must fit comfortably below v7x's 64 MiB.
    param_bytes = (H * A + A * H) * 2 + (A + 3 * H) * 4   # bf16 W, f32 vectors
    resident = 2 * param_bytes
    tile_budget = max((44 << 20) - resident, 4 << 20)
    max_tile_bytes = tile_budget // 4

    # --- Token-tile size -----------------------------------------------------
    # Multiple of 8 (sublane rule), <= block_tokens, aim for >=4 grid steps so
    # both v7x TensorCores get work and DMA overlaps compute; shrink if a tile
    # would blow the VMEM budget.
    n8 = _round_up(N, 8)
    tm_cap = max(8, _round_up(block_tokens, 8))
    tm_target = max(8, _round_up(pl.cdiv(n8, 4), 8))
    TM = min(tm_cap, tm_target)
    while TM > 8 and TM * H * itemsize > max_tile_bytes:
        TM = max(8, _round_up(TM // 2, 8))

    N_pad = _round_up(N, TM)
    if N_pad != N:
        # Padded garbage rows are LayerNormed harmlessly and sliced off below.
        x2d = jnp.pad(x2d, ((0, N_pad - N), (0, 0)))
    grid = (N_pad // TM,)

    tile_spec = pl.BlockSpec((TM, H), lambda i: (i, 0))
    const = lambda shape: pl.BlockSpec(shape, lambda i: (0, 0))

    tile_bytes = TM * H * itemsize
    vmem_bytes = int(min(max(4 * tile_bytes + resident + (4 << 20), 16 << 20),
                         48 << 20))   # 48 MiB cap leaves headroom on v7x

    out2d = pl.pallas_call(
        _adapter_kernel,
        out_shape=jax.ShapeDtypeStruct((N_pad, H), hidden_states.dtype),
        grid_spec=pltpu.PrefetchScalarGridSpec(
            num_scalar_prefetch=0,
            grid=grid,
            in_specs=[
                tile_spec,        # x        (TM, H) — pipelined per grid step
                const((H, A)),    # Wd       resident (bf16)
                const((1, A)),    # bd       resident (f32)
                const((A, H)),    # Wu       resident (bf16)
                const((1, H)),    # bu       resident (f32)
                const((1, H)),    # gamma    resident (f32)
                const((1, H)),    # beta     resident (f32)
            ],
            out_specs=tile_spec,  # y        (TM, H)
        ),
        compiler_params=pltpu.CompilerParams(
            dimension_semantics=("parallel",),   # v7x: shard grid across 2 TCs
            vmem_limit_bytes=vmem_bytes,
        ),
    )(x2d, wd, params["bd"], wu, params["bu"],
      params["gamma"], params["beta"])

    return out2d[:N].reshape(B, S, H)


def init_params(key, hidden_size, adapter_size):
    # NOTE: for production CLIP sizes keep H a multiple of 128; on v6e/v7x an
    # adapter width of 256 (not 128) fills the 256-wide MXU on both matmuls.
    k1, k2, k3, k4 = jax.random.split(key, 4)
    bd_w = 1.0 / jnp.sqrt(hidden_size)
    bu_w = 1.0 / jnp.sqrt(adapter_size)
    return {
        # stored as (in, out) so the kernel uses x @ W directly
        "wd": jax.random.uniform(k1, (hidden_size, adapter_size),
                                 jnp.float32, -bd_w, bd_w),
        "bd": jax.random.uniform(k2, (1, adapter_size),
                                 jnp.float32, -bd_w, bd_w),
        "wu": jax.random.uniform(k3, (adapter_size, hidden_size),
                                 jnp.float32, -bu_w, bu_w),
        "bu": jax.random.uniform(k4, (1, hidden_size),
                                 jnp.float32, -bu_w, bu_w),
        "gamma": jnp.ones((1, hidden_size), jnp.float32),
        "beta": jnp.zeros((1, hidden_size), jnp.float32),
    }


def _reference(x, p):
    """Pure f32 reference matching the PyTorch module."""
    x = x.astype(jnp.float32)
    h = x @ p["wd"] + p["bd"][0]
    h = 0.5 * h * (1.0 + lax.erf(h / jnp.sqrt(2.0)))
    h = h @ p["wu"] + p["bu"][0]
    h = h + x
    mean = jnp.mean(h, axis=-1, keepdims=True)
    var = jnp.mean((h - mean) ** 2, axis=-1, keepdims=True)
    return (h - mean) / jnp.sqrt(var + _LN_EPS) * p["gamma"][0] + p["beta"][0]


if __name__ == "__main__":
    key = jax.random.PRNGKey(0)

    # Tolerances are relative to the f32 reference; the kernel uses bf16 MXU
    # operands with f32 accumulation, so allow ~1e-2-scale drift.
    TOL_F32_IO = 5e-2
    TOL_BF16_IO = 1e-1

    # --- small case (multi-step grid even at tiny N) ---
    B, S, H, A = 2, 8, 32, 16
    kx, kp, key = jax.random.split(key, 3)
    x = jax.random.normal(kx, (B, S, H), jnp.float32)
    params = init_params(kp, H, A)

    out = jax.block_until_ready(text_adapter_forward(x, params))
    ref = _reference(x, params)
    assert out.shape == (B, S, H)
    assert jnp.allclose(out, ref, atol=TOL_F32_IO, rtol=TOL_F32_IO), \
        "small case mismatch"

    # --- multi-tile case: token grid, padding (N % TM != 0), lane-aligned
    #     H/A, resident-weight pipelining, user-supplied block_tokens ---
    B2, S2, H2, A2 = 3, 77, 256, 128
    kx2, kp2, key = jax.random.split(key, 3)
    x2 = jax.random.normal(kx2, (B2, S2, H2), jnp.float32)
    params2 = init_params(kp2, H2, A2)

    out2 = jax.block_until_ready(
        text_adapter_forward(x2, params2, block_tokens=128))
    ref2 = _reference(x2, params2)
    assert out2.shape == (B2, S2, H2)
    assert jnp.allclose(out2, ref2, atol=TOL_F32_IO, rtol=TOL_F32_IO), \
        "tiled case mismatch"

    # --- bf16 I/O case: halves HBM traffic when the surrounding model is bf16 ---
    x3 = x2.astype(jnp.bfloat16)
    out3 = jax.block_until_ready(text_adapter_forward(x3, params2))
    assert out3.dtype == jnp.bfloat16 and out3.shape == (B2, S2, H2)
    assert jnp.allclose(out3.astype(jnp.float32),
                        _reference(x3, params2),
                        atol=TOL_BF16_IO, rtol=TOL_BF16_IO), "bf16 case mismatch"

    print("KERNEL_OK")
</pallas_src>

<mosaic_0001>
module attributes {stable_mosaic.version = 11 : i64} {
  func.func @_adapter_kernel(%arg0: i32, %arg1: memref<8x32xf32, #tpu.memory_space<vmem>>, %arg2: memref<32x16xbf16, #tpu.memory_space<vmem>>, %arg3: memref<1x16xf32, #tpu.memory_space<vmem>>, %arg4: memref<16x32xbf16, #tpu.memory_space<vmem>>, %arg5: memref<1x32xf32, #tpu.memory_space<vmem>>, %arg6: memref<1x32xf32, #tpu.memory_space<vmem>>, %arg7: memref<1x32xf32, #tpu.memory_space<vmem>>, %arg8: memref<8x32xf32, #tpu.memory_space<vmem>>) attributes {dimension_semantics = [#tpu.dimension_semantics<parallel>], iteration_bounds = array<i64: 2>, scalar_prefetch = 0 : i64, scratch_operands = 0 : i64, tpu.core_type = #tpu.core_type<tc>, window_params = [{transform_indices = @transform_0, window_bounds = array<i64: 8, 32>}, {pipeline_mode = #tpu.pipeline_mode<synchronous>, transform_indices = @transform_1, window_bounds = array<i64: 32, 16>}, {pipeline_mode = #tpu.pipeline_mode<synchronous>, transform_indices = @transform_2, window_bounds = array<i64: 1, 16>}, {pipeline_mode = #tpu.pipeline_mode<synchronous>, transform_indices = @transform_3, window_bounds = array<i64: 16, 32>}, {pipeline_mode = #tpu.pipeline_mode<synchronous>, transform_indices = @transform_4, window_bounds = array<i64: 1, 32>}, {pipeline_mode = #tpu.pipeline_mode<synchronous>, transform_indices = @transform_5, window_bounds = array<i64: 1, 32>}, {pipeline_mode = #tpu.pipeline_mode<synchronous>, transform_indices = @transform_6, window_bounds = array<i64: 1, 32>}, {transform_indices = @transform_7, window_bounds = array<i64: 8, 32>}]} {
    %c0 = arith.constant 0 : index
    %c0_0 = arith.constant 0 : index
    %0 = vector.load %arg1[%c0, %c0_0] : memref<8x32xf32, #tpu.memory_space<vmem>>, vector<8x32xf32>
    %1 = arith.truncf %0 : vector<8x32xf32> to vector<8x32xbf16>
    %c0_1 = arith.constant 0 : index
    %c0_2 = arith.constant 0 : index
    %2 = vector.load %arg2[%c0_1, %c0_2] : memref<32x16xbf16, #tpu.memory_space<vmem>>, vector<32x16xbf16>
    %c0_3 = arith.constant 0 : index
    %c0_4 = arith.constant 0 : index
    %3 = vector.load %arg4[%c0_3, %c0_4] : memref<16x32xbf16, #tpu.memory_space<vmem>>, vector<16x32xbf16>
    %c0_5 = arith.constant 0 : index
    %c0_6 = arith.constant 0 : index
    %4 = vector.load %arg3[%c0_5, %c0_6] : memref<1x16xf32, #tpu.memory_space<vmem>>, vector<1x16xf32>
    %c0_7 = arith.constant 0 : index
    %c0_8 = arith.constant 0 : index
    %5 = vector.load %arg5[%c0_7, %c0_8] : memref<1x32xf32, #tpu.memory_space<vmem>>, vector<1x32xf32>
    %c0_9 = arith.constant 0 : index
    %c0_10 = arith.constant 0 : index
    %6 = vector.load %arg6[%c0_9, %c0_10] : memref<1x32xf32, #tpu.memory_space<vmem>>, vector<1x32xf32>
    %c0_11 = arith.constant 0 : index
    %c0_12 = arith.constant 0 : index
    %7 = vector.load %arg7[%c0_11, %c0_12] : memref<1x32xf32, #tpu.memory_space<vmem>>, vector<1x32xf32>
    %cst = arith.constant dense<0.000000e+00> : vector<8x16xf32>
    %8 = tpu.matmul %1, %2, %cst {dimension_numbers = #tpu.dot_dimension_numbers<[1], [0], [0], [1], [0, 0, 1, 1], [], []>} : vector<8x32xbf16>, vector<32x16xbf16>, vector<8x16xf32> -> vector<8x16xf32>
    %9 = vector.broadcast %4 : vector<1x16xf32> to vector<8x16xf32>
    %10 = arith.addf %8, %9 : vector<8x16xf32>
    %cst_13 = arith.constant 5.000000e-01 : f32
    %11 = vector.broadcast %cst_13 : f32 to vector<8x16xf32>
    %12 = arith.mulf %11, %10 : vector<8x16xf32>
    %cst_14 = arith.constant 0.707106769 : f32
    %13 = vector.broadcast %cst_14 : f32 to vector<8x16xf32>
    %14 = arith.mulf %10, %13 : vector<8x16xf32>
    %15 = math.erf %14 : vector<8x16xf32>
    %cst_15 = arith.constant 1.000000e+00 : f32
    %16 = vector.broadcast %cst_15 : f32 to vector<8x16xf32>
    %17 = arith.addf %16, %15 : vector<8x16xf32>
    %18 = arith.mulf %12, %17 : vector<8x16xf32>
    %19 = arith.truncf %18 : vector<8x16xf32> to vector<8x16xbf16>
    %cst_16 = arith.constant dense<0.000000e+00> : vector<8x32xf32>
    %20 = tpu.matmul %19, %3, %cst_16 {dimension_numbers = #tpu.dot_dimension_numbers<[1], [0], [0], [1], [0, 0, 1, 1], [], []>} : vector<8x16xbf16>, vector<16x32xbf16>, vector<8x32xf32> -> vector<8x32xf32>
    %21 = vector.broadcast %5 : vector<1x32xf32> to vector<8x32xf32>
    %22 = arith.addf %20, %21 : vector<8x32xf32>
    %23 = arith.addf %22, %0 : vector<8x32xf32>
    %cst_17 = arith.constant dense<0.000000e+00> : vector<8xf32>
    %24 = vector.multi_reduction <add>, %23, %cst_17 [1] : vector<8x32xf32> to vector<8xf32>
    %25 = vector.shape_cast %24 : vector<8xf32> to vector<8x1xf32>
    %cst_18 = arith.constant 3.200000e+01 : f32
    %26 = vector.broadcast %cst_18 : f32 to vector<8x1xf32>
    %27 = arith.divf %25, %26 : vector<8x1xf32>
    %28 = vector.broadcast %27 : vector<8x1xf32> to vector<8x32xf32>
    %29 = arith.subf %23, %28 : vector<8x32xf32>
    %30 = arith.mulf %29, %29 : vector<8x32xf32>
    %cst_19 = arith.constant dense<0.000000e+00> : vector<8xf32>
    %31 = vector.multi_reduction <add>, %30, %cst_19 [1] : vector<8x32xf32> to vector<8xf32>
    %32 = vector.shape_cast %31 : vector<8xf32> to vector<8x1xf32>
    %cst_20 = arith.constant 3.200000e+01 : f32
    %33 = vector.broadcast %cst_20 : f32 to vector<8x1xf32>
    %34 = arith.divf %32, %33 : vector<8x1xf32>
    %cst_21 = arith.constant 9.99999974E-6 : f32
    %35 = vector.broadcast %cst_21 : f32 to vector<8x1xf32>
    %36 = arith.addf %34, %35 : vector<8x1xf32>
    %37 = math.rsqrt %36 : vector<8x1xf32>
    %38 = vector.broadcast %37 : vector<8x1xf32> to vector<8x32xf32>
    %39 = arith.mulf %29, %38 : vector<8x32xf32>
    %40 = vector.broadcast %6 : vector<1x32xf32> to vector<8x32xf32>
    %41 = arith.mulf %39, %40 : vector<8x32xf32>
    %42 = vector.broadcast %7 : vector<1x32xf32> to vector<8x32xf32>
    %43 = arith.addf %41, %42 : vector<8x32xf32>
    %c0_22 = arith.constant 0 : index
    %c0_23 = arith.constant 0 : index
    %44 = vector.load %arg8[%c0_22, %c0_23] : memref<8x32xf32, #tpu.memory_space<vmem>>, vector<8x32xf32>
    tpu.vector_store %arg8[%c0_22, %c0_23], %43 {strides = array<i32>} : memref<8x32xf32, #tpu.memory_space<vmem>>, vector<8x32xf32>,
    return
  }
  func.func @transform_0(%arg0: i32) -> (i32, i32) {
    %c0_i32 = arith.constant 0 : i32
    %c0_i32_0 = arith.constant 0 : i32
    return %arg0, %c0_i32 : i32, i32
  }
  func.func @transform_1(%arg0: i32) -> (i32, i32) {
    %c0_i32 = arith.constant 0 : i32
    %c0_i32_0 = arith.constant 0 : i32
    %c0_i32_1 = arith.constant 0 : i32
    return %c0_i32, %c0_i32_0 : i32, i32
  }
  func.func @transform_2(%arg0: i32) -> (i32, i32) {
    %c0_i32 = arith.constant 0 : i32
    %c0_i32_0 = arith.constant 0 : i32
    %c0_i32_1 = arith.constant 0 : i32
    return %c0_i32, %c0_i32_0 : i32, i32
  }
  func.func @transform_3(%arg0: i32) -> (i32, i32) {
    %c0_i32 = arith.constant 0 : i32
    %c0_i32_0 = arith.constant 0 : i32
    %c0_i32_1 = arith.constant 0 : i32
    return %c0_i32, %c0_i32_0 : i32, i32
  }
  func.func @transform_4(%arg0: i32) -> (i32, i32) {
    %c0_i32 = arith.constant 0 : i32
    %c0_i32_0 = arith.constant 0 : i32
    %c0_i32_1 = arith.constant 0 : i32
    return %c0_i32, %c0_i32_0 : i32, i32
  }
  func.func @transform_5(%arg0: i32) -> (i32, i32) {
    %c0_i32 = arith.constant 0 : i32
    %c0_i32_0 = arith.constant 0 : i32
    %c0_i32_1 = arith.constant 0 : i32
    return %c0_i32, %c0_i32_0 : i32, i32
  }
  func.func @transform_6(%arg0: i32) -> (i32, i32) {
    %c0_i32 = arith.constant 0 : i32
    %c0_i32_0 = arith.constant 0 : i32
    %c0_i32_1 = arith.constant 0 : i32
    return %c0_i32, %c0_i32_0 : i32, i32
  }
  func.func @transform_7(%arg0: i32) -> (i32, i32) {
    %c0_i32 = arith.constant 0 : i32
    %c0_i32_0 = arith.constant 0 : i32
    return %arg0, %c0_i32 : i32, i32
  }
}

</mosaic_0001>

<bundles_post_ra>
// kernel: text_adapter_forward.1
= control target key start
LH: loop header
LB: loop body
LE: loop exit
PB: predicated region body
PF: predicated region fallthrough
CT: control target
= control target key end

     0   :  { %12 = vsyncpa [#allocation3], 0  ;;  %s817_s0 = inlined_call_operand.vmem [shape: f32[16,32], index: 0, kind: input, shape index: {}]   ;;  %s818_s1 = inlined_call_operand.vmem [shape: bf16[32,16], index: 1, kind: input, shape index: {}]   ;;  %s819_s2 = inlined_call_operand.vmem [shape: f32[1,16], index: 2, kind: input, shape index: {}]   ;;  %s820_s3 = inlined_call_operand.vmem [shape: bf16[16,32], index: 3, kind: input, shape index: {}]   ;;  %s821_s4 = inlined_call_operand.vmem [shape: f32[1,32], index: 4, kind: input, shape index: {}]   ;;  %s822_s5 = inlined_call_operand.vmem [shape: f32[1,32], index: 5, kind: input, shape index: {}]   ;;  %s823_s6 = inlined_call_operand.vmem [shape: f32[1,32], index: 6, kind: input, shape index: {}]   ;;  %s824_s7 = inlined_call_operand.hbm [shape: f32[16,32], index: 7, kind: output, shape index: {}]  }
   0x1   :  { %14 = vsyncpa [#allocation3 + $0x1], 0  ;;  %s705_s24 = smov 0   ;;  %s707_s25 = smov 0  }
   0x2   :  { %s709_s26 = smov 0   ;;  %s711_s27 = smov 0  }
   0x3 LB: > { %s726_s28 = sadd.s32 4294967295, %s660_s27   ;;  %s514_s29 = sadd.s32 4294967294, %s660_s27   ;;  %s660_s27 = sphi %s711_s27, %s830_s27   ;;  %s656_s26 = sphi %s709_s26, %s829_s26   ;;  %s652_s25 = sphi %s707_s25, %s828_s25   ;;  %s648_s24 = sphi %s705_s24, %s827_s24  }
   0x4   : > { %s730_s30 = sadd.s32 1, %s660_s27   ;;  %s179_s8 = sadd.s32 1, %s656_s26 }
   0x5   : > { %s176_s9 = ssub.s32 %s660_s27, %s730_s30  ;;  %p189_p0 = scmp.ne.s32.totalorder %s656_s26, %s652_s25 }
   0x6   : > { %p177_p1 = scmp.eq.s32.totalorder %s176_s9, 0  ;;  %p190_p2 = scmp.eq.s32.totalorder %s726_s28, 1 }
   0x7   : > { %p195_p3 = scmp.ne.s32.totalorder %s652_s25, %s648_s24  ;;  %p196_p4 = scmp.eq.s32.totalorder %s514_s29, 1 }
   0x8   : > { %s741_s10 = scalar_select %p177_p1, %s656_s26, %s179_s8  }
   0x9   : > { %p743_p5 = por %p190_p2, %p189_p0  ;;  %p747_p6 = por %p196_p4, %p195_p3 }
   0xa   : > { %p517_p7 = scmp.ge.s32.totalorder %s660_s27, 1  ;;  %p239_p8 = scmp.lt.s32.totalorder %s660_s27, 3 }
   0xc   : > { %p240_p9 = pnand %p517_p7, %p239_p8 }
   0xd   : > { %p270_p10 = scmp.lt.s32.totalorder (!%p240_p9), %s726_s28, 1  ;;  %s267_s14 = sand.u32 (!%p240_p9), 1, %s652_s25  }
   0xe   : > { %243 = sbr.rel (%p240_p9) target bundleno = 763 (0x2fb), region = 48  ;;  %s518_s15 = sshll.u32 (!%p240_p9), %s267_s14, 3 }
   0xf   : > { %s530_s20 = sshll.u32 (!%p240_p9), %s726_s28, 7  ;;  %s442_s9 = scalar_lea.sflag (!%p240_p9), [#allocation3], %s267_s14 }
  0x10   : > { %s453_s8 = scalar_lea.hbm (!%p240_p9), %s824_s7, %s530_s20  ;;  %s664_s16 = smov (!%p240_p9), [#allocation2]  }
  0x13   : > { %v593_v0 = vld [vmem:[%s818_s1 + $0x8] sm:$0xff]   ;;  %v662_v1 = vmov 0.0   ;;  %v594_v2 = vld [vmem:[%s818_s1] sm:$0xff]   ;;  %vm663_vm0 = vmmov 0   ;;  %s271_s17 = scalar_select %p270_p10, %s726_s28, 1  ;;  %vm305_vm1 = vcmask 261120  }
  0x14   : > { %538 = vmatprep.subr.bf16.mxu0 %v662_v1  ;;  %546 = vmatprep.subr.bf16.mxu1 %v662_v1  ;;  %v595_v5 = vld [vmem:[%s820_s3] sm:$0xff]   ;;  %vm367_vm2 = vcmask 130048  }
  0x15   : > { %539 = vmatpush3.bf16.msra.mxu0 %v593_v0  ;;  %542 = vmatprep.mubr.msk.bf16.mxu0 %vm663_vm0, %v662_v1  ;;  %s519_s18 = sshll.u32 %s271_s17, 3  ;;  %v520_v6 = vld [vmem:[%s819_s2] ss:$0 sm:$0xff]  ;;  %s604_s17 = sshll.u32 %s664_s16, 4  ;;  %s605_s17 = int_to_ptr.vmem [resolvable:$false] %s604_s17 }
  0x16   : > { %540 = vmatprep.subr.bf16.mxu0 %v662_v1  ;;  %548 = vmatprep.mubr.msk.bf16.mxu1 %vm663_vm0, %v662_v1  ;;  %s273_s21 = scalar_lea.vmem %s817_s0, %s519_s18  ;;  %v524_v18 = vld [vmem:[%s821_s4] ss:$0 sm:$0xff]  ;;  %s606_s28 = scalar_lea.vmem %s605_s17, 256 }
  0x17   : > { %v275_v3 = vld [vmem:[%s273_s21] sm:$0xff]  ;;  %547 = vmatpush3.bf16.msra.mxu1 %v595_v5  ;;  %s269_s21 = scalar_lea.vmem [#allocation2], %s518_s15 }
  0x18   : > { %v276_v4 = vpack.c.bf16 %v275_v3, %v275_v3  ;;  %v527_v35 = vld [vmem:[%s822_s5] ss:$0 sm:$0xff]  ;;  %s455_s22 = sshll.u32 %s269_s21, 4  ;;  %s456_s22 = int_to_ptr.vmem [resolvable:$true] %s455_s22 }
  0x19   : > { %541 = vmatpush3.bf16.msra.mxu0 %v594_v2  ;;  %v528_v37 = vld [vmem:[%s823_s6] ss:$0 sm:$0xff]  ;;  %s600_s13 = scalar_lea.vmem %s456_s22, 128  ;;  %p607_p0 = scmp.lt.s32.totalorder %s456_s22, %s605_s17 }
  0x1a   : > { %p601_p11 = scmp.ne.s32.totalorder %s456_s22, %s600_s13  ;;  %p608_p1 = scmp.lt.s32.totalorder %s606_s28, %s600_s13 }
  0x1c   : > { %543 = vmatmul.mubr.msk.bf16.vlgmr.msra.gmra.mxu0 %vm305_vm1, %v276_v4  ;;  %p602_p12 = pnand %p601_p11, %p743_p5  ;;  %p609_p2 = por %p608_p1, %p607_p0 }
  0x1e   : > { %p603_p13 = pneg %p602_p12 }
  0x20   : > { %p610_p3 = pnand %p609_p2, %p603_p13 }
  0xdc   : > { %v343_v7 = vpop.f32.mrf.mxu0 }
  0xdd   : > { %v344_v8 = vadd.f32 %v520_v6, %v343_v7 }
  0xde   : > { %v544_v9 = vpop.f32.mrf.mxu0 }
  0xdf   : > { %v350_v10 = vmul.f32 0.70710677, %v344_v8  ;;  %v349_v14 = vmul.f32 0.5, %v344_v8 }
  0xe0   : > { %v346_v11 = vpop.f32.mrf.mxu0 }
  0xe1   : > { %596 = verf.f32 %v350_v10 }
  0xe2   : > { %v545_v12 = vpop.f32.mrf.mxu0 }
  0xee   : > { %v597_v13 = vpop.eup %596 }
  0xef   : > { %v352_v15 = vadd.f32 1.0, %v597_v13 }
  0xf1   : > { %v353_v16 = vmul.f32 %v352_v15, %v349_v14 }
  0xf3   : > { %v354_v17 = vpack.c.bf16 %v353_v16, %v353_v16 }
  0xf5   : > { %549 = vmatmul.mubr.msk.bf16.vlgmr.msra.gmra.mxu1 %vm367_vm2, %v354_v17 }
 0x1b5   : > { %v405_v19 = vpop.f32.mrf.mxu1 }
 0x1b6   : > { %v406_v20 = vadd.f32 %v524_v18, %v405_v19 }
 0x1b7   : > { %v550_v21 = vpop.f32.mrf.mxu1 }
 0x1b8   : > { %v411_v22 = vadd.f32 %v406_v20, %v275_v3 }
 0x1b9   : > { %v408_v23 = vpop.f32.mrf.mxu1 }
 0x1ba   : > { %v412_v24 = vsel %vm305_vm1, %v411_v22, 0.0 }
 0x1bb   : > { %413 = vadd.xlane.f32.xlu0 %v412_v24  ;;  %v551_v25 = vpop.f32.mrf.mxu1 }
 0x244   : > { %v414_v26 = vpop.xlane.xlu0 %413 }
 0x245   : > { %v416_v27 = vmul.f32 0.03125, %v414_v26 }
 0x247   : > { %v417_v28 = vsub.f32 %v411_v22, %v416_v27 }
 0x249   : > { %v418_v29 = vmul.f32 %v417_v28, %v417_v28 }
 0x24b   : > { %v419_v30 = vsel %vm305_vm1, %v418_v29, 0.0 }
 0x24c   : > { %420 = vadd.xlane.f32.xlu0 %v419_v30 }
 0x2d5   : > { %v421_v31 = vpop.xlane.xlu0 %420 }
 0x2d6   : > { %v422_v32 = vmul.f32 0.03125, %v421_v31 }
 0x2d8   : > { %v423_v33 = vadd.f32 1e-05, %v422_v32 }
 0x2da   : > { %598 = vrsqrt.f32 %v423_v33 }
 0x2e7   : > { %v599_v34 = vpop.eup %598 }
 0x2e8   : > { %v425_v36 = vmul.f32 %v599_v34, %v417_v28 }
 0x2ea   : > { %v432_v38 = vmul.f32 %v527_v35, %v425_v36 }
 0x2ec   : > { %v439_v39 = vadd.f32 %v528_v37, %v432_v38 }
 0x2ee   : > { %440 = vst.msk [vmem:[%s269_s21] sm:$0xff] %vm305_vm1, %v439_v39 }
 0x2ef   : > { %613 = shalt.err (!%p610_p3)
}
 0x2f0   : > { %s614_s15 = scalar_lea.hbm %s453_s8, 128  ;;  %s618_s19 = scalar_lea.hbm %s824_s7, 256 }
 0x2f1   : > { %p615_p4 = scmp.ne.s32.totalorder %s453_s8, %s614_s15  ;;  %p619_p9 = scmp.lt.s32.totalorder %s453_s8, %s824_s7 }
 0x2f2   : > { %p620_p10 = scmp.lt.s32.totalorder %s618_s19, %s614_s15 }
 0x2f3   : > { %p616_p7 = pnand %p615_p4, %p743_p5 }
 0x2f4   : > { %p621_p11 = por %p620_p10, %p619_p9 }
 0x2f5   : > { %p617_p8 = pneg %p616_p7 }
 0x2f7   : > { %p622_p12 = pnand %p621_p11, %p617_p8 }
 0x2f9   : > { %625 = shalt.err (!%p622_p12)
}
 0x2fa   : > { %552 = dma.vmem_to_hbm [thread:$0]  (%p743_p5), %s456_s22, 128, %s453_s8, %s442_s9  }
 0x2fb PF: > { %p558_p13 = scmp.ge.s32.totalorder %s660_s27, 2  ;;  %s467_s23 = sand.u32 1, %s648_s24  }
 0x2fc   : > { %s468_s29 = scalar_lea.sflag [#allocation3], %s467_s23 }
 0x2fd   : > { %p555_p0 = pnand %p558_p13, %p747_p6 }
 0x2ff   : > { %p556_p1 = pneg %p555_p0 }
 0x301   : > { %643 = dma.done.wait (%p556_p1), %s468_s29, 128  }
 0x302   : > { %645 = vsyncadd (%p556_p1), %s468_s29, 4294967168  ;;  %p17_p2 = scmp.ge.s32.totalorder %s730_s30, 4   ;;  %s827_s24 = smov %s652_s25 }
 0x303   : > { %s828_s25 = smov %s656_s26  ;;  %s829_s26 = smov %s741_s10 }
 0x304   : > { %s830_s27 = smov %s730_s30  ;;  %19 = sbr.rel (!%p17_p2) target bundleno = 3 (0x3), region = 83 }
 0x309   :  { %473 = vsyncpa [#allocation3], 1 }
 0x30a   :  { %475 = vsyncpa [#allocation3 + $0x1], 1 }

</bundles_post_ra>
